<compile_context>
chip_gen: v5e
topology: v5e:2x2
jax: 0.10.0
libtpu: 0.0.40
codegen_flags: <defaults>
</compile_context>

<pallas_src>
import functools

import jax
import jax.numpy as jnp
from jax.experimental import pallas as pl
from jax.experimental.pallas import tpu as pltpu

LRELU_SLOPE = 0.1


def _cdiv(a, b):
    return -(-a // b)


# ----------------------------------------------------------------------------
# Hardware-aware budgets & feature probes
# ----------------------------------------------------------------------------
@functools.lru_cache(maxsize=None)
def _vmem_budgets():
    """(vmem_limit_bytes, per-call working-set budget) for this generation."""
    vmem = None
    try:
        info = pltpu.get_tpu_info()
        v = int(getattr(info, "vmem_capacity_bytes", 0) or 0)
        vmem = v if v > 0 else None
    except Exception:
        vmem = None
    if vmem is None:
        try:
            kind = jax.devices()[0].device_kind.lower()
            if "v2" in kind or "v3" in kind:
                vmem = 16 * 1024 * 1024
            elif "v4" in kind or "v5" in kind or "v6" in kind:
                vmem = 128 * 1024 * 1024
            else:                      # v7x and unknown: be conservative
                vmem = 64 * 1024 * 1024
        except Exception:
            vmem = 64 * 1024 * 1024
    limit = min(int(vmem * 0.85), 120 * 1024 * 1024)
    budget = int(vmem * 0.45)
    return limit, budget


@functools.lru_cache(maxsize=None)
def _buffered_ok():
    """Probe whether pipeline_mode=pl.Buffered(1) is supported on this install."""
    try:
        def _k(x_ref, o_ref):
            o_ref[...] = x_ref[...]
        out = pl.pallas_call(
            _k,
            out_shape=jax.ShapeDtypeStruct((8, 128), jnp.float32),
            grid=(2,),
            in_specs=[pl.BlockSpec((8, 128), lambda i: (0, 0),
                                   pipeline_mode=pl.Buffered(1))],
            out_specs=pl.BlockSpec((8, 128), lambda i: (0, 0)),
        )(jnp.zeros((8, 128), jnp.float32))
        jax.block_until_ready(out)
        return True
    except Exception:
        return False


def _const_spec(shape, index_map):
    """BlockSpec for a grid-invariant operand: single-buffered when supported."""
    if _buffered_ok():
        return pl.BlockSpec(shape, index_map, pipeline_mode=pl.Buffered(1))
    return pl.BlockSpec(shape, index_map)


def _t_target(budget, fixed_bytes, per_t_bytes, cap):
    avail = budget - fixed_bytes
    if avail < (1 << 20):
        avail = 1 << 20
    return int(max(128, min(cap, avail // max(per_t_bytes, 1))))


def _choose_tiling(t_out, unit, target, batch):
    """Pick (t_tile, nt). t_tile is a multiple of `unit` (itself a multiple of
    128). Partial edge blocks are allowed, so no exact-divisor search and no
    single-full-length fallback.  For B==1, force nt >= 2 so v7x's two
    TensorCores both get work on the "parallel" grid."""
    target = max(unit, (target // unit) * unit)
    if batch * _cdiv(t_out, target) < 2 and t_out > unit:
        half = unit * _cdiv(_cdiv(t_out, 2), unit)
        target = max(unit, min(target, half))
    t_tile = min(target, unit * _cdiv(t_out, unit))
    return t_tile, _cdiv(t_out, t_tile)


def _window_specs(c, t_tile, halo_pad, t_in):
    """Three BlockSpecs over the *unpadded* input: the halo_pad-aligned block
    before the current tile, the tile itself, and the block after it.  Edge
    block indices are clamped; the kernel masks by global position, so the
    clamped garbage never contributes."""
    ratio = t_tile // halo_pad
    n_main = max(_cdiv(t_in, t_tile), 1)
    n_halo = max(_cdiv(t_in, halo_pad), 1)
    prev = pl.BlockSpec(
        (1, c, halo_pad),
        lambda bi, ti: (bi, 0, jnp.clip(ti * ratio - 1, 0, n_halo - 1)))
    main = pl.BlockSpec(
        (1, c, t_tile),
        lambda bi, ti: (bi, 0, jnp.minimum(ti, n_main - 1)))
    nxt = pl.BlockSpec(
        (1, c, halo_pad),
        lambda bi, ti: (bi, 0, jnp.clip((ti + 1) * ratio, 0, n_halo - 1)))
    return prev, main, nxt


# ----------------------------------------------------------------------------
# Fused [leaky] -> conv1d (K accumulated MXU matmuls) -> bias -> [tanh]
# ----------------------------------------------------------------------------
def _conv1d_kernel(xp_ref, xm_ref, xn_ref, w_ref, b_ref, o_ref, *,
                   n_taps, dilation, pad_left, t_tile, halo_pad, t_in,
                   act_in_slope, act_out_tanh, compute_dtype):
    def prep(v):
        v = v.astype(compute_dtype)
        if act_in_slope is not None:
            # leaky(0) == 0, so activating the zero-masked window is identical
            # to padding the activated signal.
            v = jnp.where(v > 0, v, act_in_slope * v)
        return v

    xw = jnp.concatenate([prep(xp_ref[0]), prep(xm_ref[0]), prep(xn_ref[0])],
                         axis=-1)
    # In-kernel zero padding: mask every column whose global position falls
    # outside [0, t_in) (replaces the wrapper-side jnp.pad HBM pass).
    base = pl.program_id(1) * t_tile - halo_pad
    pos = jax.lax.broadcasted_iota(jnp.int32, (1, xw.shape[-1]), 1) + base
    xw = jnp.where((pos >= 0) & (pos < t_in), xw, 0)

    acc = None
    for k in range(n_taps):
        off = halo_pad - pad_left + k * dilation
        term = jnp.dot(w_ref[k], xw[:, off:off + t_tile],
                       preferred_element_type=jnp.float32)
        acc = term if acc is None else acc + term
    acc = acc + b_ref[...]
    if act_out_tanh:
        acc = jnp.tanh(acc)
    o_ref[0] = acc.astype(o_ref.dtype)


def pallas_conv1d(x, w, b=None, *, dilation=1, padding=0, act_in_slope=None,
                  act_out_tanh=False, out_dtype=None,
                  compute_dtype=jnp.bfloat16, t_tile_target=8192):
    """Stride-1 Conv1d.  x:(B,Cin,T), w:(Cout,Cin,K), b:(Cout,)|None."""
    B, c_in, T = x.shape
    c_out, _, K = w.shape
    out_dtype = out_dtype or x.dtype
    halo = dilation * (K - 1)
    t_out = T + 2 * padding - halo
    H = 128 * _cdiv(max(padding, halo - padding, 1), 128)

    in_b = x.dtype.itemsize
    out_b = jnp.dtype(out_dtype).itemsize
    cb = jnp.dtype(compute_dtype).itemsize
    vmem_limit, budget = _vmem_budgets()
    n_wbuf = 1 if _buffered_ok() else 2
    fixed = (K * c_out * c_in * cb + c_out * 4) * n_wbuf + 4 * c_in * H * in_b
    per_t = int(1.3 * ((2 * in_b + 2 * cb) * c_in + (2 * out_b + 8) * c_out))
    target = _t_target(budget, fixed, per_t, t_tile_target)
    t_tile, nt = _choose_tiling(t_out, H, target, B)

    w_t = jnp.transpose(w, (2, 0, 1)).astype(compute_dtype)      # (K, Cout, Cin)
    bias = (jnp.zeros((c_out,), jnp.float32) if b is None
            else b.astype(jnp.float32)).reshape(c_out, 1)

    hp, hm, hn = _window_specs(c_in, t_tile, H, T)
    kern = functools.partial(
        _conv1d_kernel, n_taps=K, dilation=dilation, pad_left=padding,
        t_tile=t_tile, halo_pad=H, t_in=T, act_in_slope=act_in_slope,
        act_out_tanh=act_out_tanh, compute_dtype=compute_dtype)
    return pl.pallas_call(
        kern,
        out_shape=jax.ShapeDtypeStruct((B, c_out, t_out), out_dtype),
        grid=(B, nt),
        in_specs=[
            hp, hm, hn,
            _const_spec((K, c_out, c_in), lambda bi, ti: (0, 0, 0)),
            _const_spec((c_out, 1), lambda bi, ti: (0, 0)),
        ],
        out_specs=pl.BlockSpec((1, c_out, t_tile), lambda bi, ti: (bi, 0, ti)),
        compiler_params=pltpu.CompilerParams(
            dimension_semantics=("parallel", "parallel"),
            vmem_limit_bytes=vmem_limit),
    )(x, x, x, w_t, bias)


# ----------------------------------------------------------------------------
# ConvTranspose1d as a polyphase conv (no zero-stuffing)
# ----------------------------------------------------------------------------
def pallas_conv_transpose1d(x, w_t, b, *, stride, padding, act_in_slope=None,
                            out_dtype=None, compute_dtype=jnp.bfloat16,
                            t_tile_target=8192):
    """PyTorch ConvTranspose1d(stride, padding) semantics.  w_t:(Cin,Cout,K).
    The `stride` output phases are computed by one ordinary conv whose output
    channels are (phase, Cout) stacked, then interleaved and cropped."""
    B, c_in, T = x.shape
    _, c_out, K = w_t.shape
    s = stride
    jmax = _cdiv(K, s)
    r = jnp.arange(s)[:, None]
    j = jnp.arange(jmax)[None, :]
    kk = r + (jmax - 1 - j) * s                   # original tap per (phase, j)
    valid = (kk < K).astype(w_t.dtype)
    w_g = w_t[:, :, jnp.clip(kk, 0, K - 1)] * valid[None, None]
    w_poly = jnp.transpose(w_g, (2, 1, 0, 3)).reshape(s * c_out, c_in, jmax)
    b_poly = None if b is None else jnp.tile(b, s)

    y = pallas_conv1d(x, w_poly, b_poly, dilation=1, padding=jmax - 1,
                      act_in_slope=act_in_slope, out_dtype=out_dtype,
                      compute_dtype=compute_dtype, t_tile_target=t_tile_target)
    q = y.shape[-1]                               # == T + jmax - 1
    # TODO(synk): the phase interleave + crop is still a wrapper-side memory
    # pass; folding it into the conv kernel's store (lane-dense interleaved
    # write + shifted output tiles) would remove ~1 HBM pass per upsample.
    y = y.reshape(B, s, c_out, q).transpose(0, 2, 3, 1).reshape(B, c_out, q * s)
    t_out = (T - 1) * s - 2 * padding + K
    return y[:, :, padding:padding + t_out]


# ----------------------------------------------------------------------------
# Fused ResBlock1 (all dilated pairs + residuals + cond bias + xs accumulation)
# ----------------------------------------------------------------------------
def _resblock_kernel(*refs, n_pairs, k_taps, dilations, t_tile, halo_pad,
                     t_valid, has_prev, out_scale, compute_dtype):
    if has_prev:
        (xp_ref, xm_ref, xn_ref, cond_ref, w1_ref, b1_ref, w2_ref, b2_ref,
         prev_ref, o_ref) = refs
    else:
        (xp_ref, xm_ref, xn_ref, cond_ref, w1_ref, b1_ref, w2_ref, b2_ref,
         o_ref) = refs
        prev_ref = None

    pads = [(((k_taps - 1) // 2) * d, (k_taps - 1) // 2) for d in dilations]
    suf = [0] * (n_pairs + 1)
    for i in range(n_pairs - 1, -1, -1):
        suf[i] = suf[i + 1] + pads[i][0] + pads[i][1]
    s0 = suf[0]

    base = pl.program_id(1) * t_tile
    w_full = t_tile + 2 * halo_pad
    # One hoisted iota / validity mask per invocation; every boundary mask is a
    # static slice of it (reproduces the reference's per-conv zero padding).
    pos0 = jax.lax.broadcasted_iota(jnp.int32, (1, w_full), 1) + (base - halo_pad)
    valid0 = (pos0 >= 0) & (pos0 < t_valid)

    def mask_cols(arr, left_margin):
        off = halo_pad - left_margin
        return jnp.where(valid0[:, off:off + arr.shape[-1]], arr, 0.0)

    xin = jnp.concatenate([xp_ref[0], xm_ref[0], xn_ref[0]], axis=-1)
    cur = xin[:, halo_pad - s0:halo_pad + t_tile + s0].astype(jnp.float32)
    cur = cur + cond_ref[0]                       # g-conditioning bias (ch, 1)
    cur = mask_cols(cur, s0)

    for i in range(n_pairs):
        p1, p2 = pads[i]
        d = dilations[i]
        l_next = t_tile + 2 * suf[i + 1]
        l_mid = l_next + 2 * p2
        a = jnp.where(cur > 0, cur, LRELU_SLOPE * cur).astype(compute_dtype)
        mid = None
        for k in range(k_taps):                   # accumulated MXU matmuls
            term = jnp.dot(w1_ref[i, k], a[:, k * d:k * d + l_mid],
                           preferred_element_type=jnp.float32)
            mid = term if mid is None else mid + term
        mid = mask_cols(mid + b1_ref[i], p2 + suf[i + 1])
        m = jnp.where(mid > 0, mid, LRELU_SLOPE * mid).astype(compute_dtype)
        xt = None
        for k in range(k_taps):
            term = jnp.dot(w2_ref[i, k], m[:, k:k + l_next],
                           preferred_element_type=jnp.float32)
            xt = term if xt is None else xt + term
        xt = xt + b2_ref[i]
        off = p1 + p2
        cur = mask_cols(cur[:, off:off + l_next] + xt, suf[i + 1])

    out = cur
    if has_prev:
        out = out + prev_ref[0].astype(jnp.float32)
    if out_scale != 1.0:
        out = out * out_scale
    o_ref[0] = out.astype(o_ref.dtype)


def pallas_resblock(x, prev, cond_bias, convs1, convs2, *, kernel_size,
                    dilations, out_scale=1.0, compute_dtype=jnp.bfloat16,
                    t_tile_target=8192):
    B, ch, T = x.shape
    K = kernel_size
    n_pairs = len(dilations)
    pads = [(((K - 1) // 2) * d, (K - 1) // 2) for d in dilations]
    s0 = sum(p1 + p2 for p1, p2 in pads)
    H = 128 * _cdiv(max(s0, 1), 128)

    in_b = x.dtype.itemsize
    cb = jnp.dtype(compute_dtype).itemsize
    vmem_limit, budget = _vmem_budgets()
    n_wbuf = 1 if _buffered_ok() else 2
    fixed = (2 * n_pairs * K * ch * ch * cb + 2 * n_pairs * ch * 4) * n_wbuf \
            + 4 * ch * H * in_b + 2 * ch * 4
    per_prev = 2 * in_b if prev is not None else 0
    per_t = int(1.25 * ch * (2 * in_b + per_prev + 2 * in_b + 12 + 3 * cb + 4))
    target = _t_target(budget, fixed, per_t, t_tile_target)
    t_tile, nt = _choose_tiling(T, H, target, B)

    def fold(c):
        return jnp.transpose(c["w"], (2, 0, 1))          # (K, Cout, Cin)

    w1 = jnp.stack([fold(c) for c in convs1]).astype(compute_dtype)
    w2 = jnp.stack([fold(c) for c in convs2]).astype(compute_dtype)
    b1 = jnp.stack([c["b"].reshape(ch, 1) for c in convs1]).astype(jnp.float32)
    b2 = jnp.stack([c["b"].reshape(ch, 1) for c in convs2]).astype(jnp.float32)

    hp, hm, hn = _window_specs(ch, t_tile, H, T)
    c4 = lambda bi, ti: (0, 0, 0, 0)
    c3 = lambda bi, ti: (0, 0, 0)
    in_specs = [
        hp, hm, hn,
        pl.BlockSpec((1, ch, 1), lambda bi, ti: (bi, 0, 0)),   # varies with bi
        _const_spec((n_pairs, K, ch, ch), c4),
        _const_spec((n_pairs, ch, 1), c3),
        _const_spec((n_pairs, K, ch, ch), c4),
        _const_spec((n_pairs, ch, 1), c3),
    ]
    args = [x, x, x, cond_bias, w1, b1, w2, b2]
    io_alias = {}
    if prev is not None:
        in_specs.append(pl.BlockSpec((1, ch, t_tile),
                                     lambda bi, ti: (bi, 0, ti)))
        args.append(prev)
        io_alias = {len(args) - 1: 0}             # accumulate xs in place (P8)

    # TODO(synk): for late layers (ch<=64) the first dilated conv of the
    # num_kernels parallel resblocks could be stacked to raise MXU M-occupancy.
    kern = functools.partial(
        _resblock_kernel, n_pairs=n_pairs, k_taps=K,
        dilations=tuple(dilations), t_tile=t_tile, halo_pad=H, t_valid=T,
        has_prev=prev is not None, out_scale=out_scale,
        compute_dtype=compute_dtype)
    return pl.pallas_call(
        kern,
        out_shape=jax.ShapeDtypeStruct((B, ch, T), x.dtype),
        grid=(B, nt),
        in_specs=in_specs,
        out_specs=pl.BlockSpec((1, ch, t_tile), lambda bi, ti: (bi, 0, ti)),
        input_output_aliases=io_alias,
        compiler_params=pltpu.CompilerParams(
            dimension_semantics=("parallel", "parallel"),
            vmem_limit_bytes=vmem_limit),
    )(*args)


# ----------------------------------------------------------------------------
# Parameters (deterministic synthetic init; weight_norm folded)
# ----------------------------------------------------------------------------
def init_generator(key, initial_channel, resblock_kernel_sizes,
                   resblock_dilation_sizes, upsample_rates,
                   upsample_initial_channel, upsample_kernel_sizes,
                   gin_channels):
    keys = iter(jax.random.split(key, 256))

    def conv(c_out, c_in, k, bias=True, scale=0.05):
        kw, kb = jax.random.split(next(keys))
        p = {"w": scale * jax.random.normal(kw, (c_out, c_in, k), jnp.float32)}
        p["b"] = (scale * jax.random.normal(kb, (c_out,), jnp.float32)
                  if bias else None)
        return p

    params = {"conv_pre": conv(upsample_initial_channel, initial_channel, 7)}
    params["ups"] = []
    for i, (u, k) in enumerate(zip(upsample_rates, upsample_kernel_sizes)):
        c_in = upsample_initial_channel // (2 ** i)
        c_out = upsample_initial_channel // (2 ** (i + 1))
        kw, kb = jax.random.split(next(keys))
        params["ups"].append({
            # weight_norm + init_weights(std=0.01) folded to a plain weight
            "w_t": 0.01 * jax.random.normal(kw, (c_in, c_out, k), jnp.float32),
            "b": 0.01 * jax.random.normal(kb, (c_out,), jnp.float32),
            "stride": u, "pad": (k - u) // 2,
        })
    params["resblocks"] = []
    ch = upsample_initial_channel
    for i in range(len(upsample_rates)):
        ch = upsample_initial_channel // (2 ** (i + 1))
        row = []
        for k, ds in zip(resblock_kernel_sizes, resblock_dilation_sizes):
            rb = {"cond": conv(ch, gin_channels, 1), "k": k, "dils": list(ds),
                  "convs1": [conv(ch, ch, k) for _ in ds],
                  "convs2": [conv(ch, ch, k) for _ in ds]}
            row.append(rb)
        params["resblocks"].append(row)
    params["conv_post"] = conv(1, ch, 7, bias=False)
    return params


# ----------------------------------------------------------------------------
# Forward pass (mirrors Generator.forward)
# ----------------------------------------------------------------------------
def generator_forward(params, x, g, *, compute_dtype=jnp.bfloat16,
                      t_tile_target=8192):
    act_dtype = compute_dtype            # inter-layer activation storage dtype
    # TODO(synk): emotional-vits modules.py not provided; assumed ResBlock1
    # applies `x = x + Conv1d(gin, ch, 1)(g)` once before its dilated conv
    # stack.  All 1x1 GEMVs are issued up-front and fed to the fused kernels
    # as per-(batch, channel) biases.
    cond_biases = [
        [(jnp.einsum("og,bg->bo", rb["cond"]["w"][:, :, 0], g[:, :, 0])
          + rb["cond"]["b"])[..., None].astype(jnp.float32)
         for rb in row]
        for row in params["resblocks"]]

    x = pallas_conv1d(x, params["conv_pre"]["w"], params["conv_pre"]["b"],
                      padding=3, out_dtype=act_dtype,
                      compute_dtype=compute_dtype, t_tile_target=t_tile_target)
    num_kernels = len(params["resblocks"][0])
    for i, up in enumerate(params["ups"]):
        # F.leaky_relu(x, LRELU_SLOPE) is fused into the upsample conv.
        x = pallas_conv_transpose1d(x, up["w_t"], up["b"], stride=up["stride"],
                                    padding=up["pad"],
                                    act_in_slope=LRELU_SLOPE,
                                    out_dtype=act_dtype,
                                    compute_dtype=compute_dtype,
                                    t_tile_target=t_tile_target)
        xs = None
        for j in range(num_kernels):
            rb = params["resblocks"][i][j]
            scale = 1.0 / num_kernels if j == num_kernels - 1 else 1.0
            xs = pallas_resblock(x, xs, cond_biases[i][j], rb["convs1"],
                                 rb["convs2"], kernel_size=rb["k"],
                                 dilations=rb["dils"], out_scale=scale,
                                 compute_dtype=compute_dtype,
                                 t_tile_target=t_tile_target)
        x = xs
    # final F.leaky_relu uses PyTorch's default slope 0.01; tanh fused in-kernel
    # TODO(synk): conv_post (Cout=1) could be a VPU multiply-add reduction
    # instead of an M=1 MXU matmul on v6e/v7x.
    x = pallas_conv1d(x, params["conv_post"]["w"], None, padding=3,
                      act_in_slope=0.01, act_out_tanh=True,
                      out_dtype=jnp.float32, compute_dtype=compute_dtype,
                      t_tile_target=t_tile_target)
    return x


# ----------------------------------------------------------------------------
# Pure-JAX reference (same assumed semantics) for numerical validation
# ----------------------------------------------------------------------------
def _ref_conv1d(x, w, b, dilation=1, padding=0):
    out = jax.lax.conv_general_dilated(
        x, w, window_strides=(1,), padding=[(padding, padding)],
        rhs_dilation=(dilation,), dimension_numbers=("NCH", "OIH", "NCH"),
        precision=jax.lax.Precision.HIGHEST)
    return out if b is None else out + b[None, :, None]


def _ref_conv_transpose1d(x, w_t, b, stride, padding):
    K = w_t.shape[-1]
    out = jax.lax.conv_general_dilated(
        x, jnp.transpose(w_t, (1, 0, 2))[:, :, ::-1],
        window_strides=(1,), padding=[(K - 1 - padding, K - 1 - padding)],
        lhs_dilation=(stride,), dimension_numbers=("NCH", "OIH", "NCH"),
        precision=jax.lax.Precision.HIGHEST)
    return out if b is None else out + b[None, :, None]


def generator_forward_ref(params, x, g):
    p = params["conv_pre"]
    x = _ref_conv1d(x, p["w"], p["b"], padding=3)
    num_kernels = len(params["resblocks"][0])
    for i, up in enumerate(params["ups"]):
        x = jnp.where(x > 0, x, LRELU_SLOPE * x)
        x = _ref_conv_transpose1d(x, up["w_t"], up["b"], up["stride"], up["pad"])
        xs = None
        for j in range(num_kernels):
            rb = params["resblocks"][i][j]
            cond = (jnp.einsum("og,bg->bo", rb["cond"]["w"][:, :, 0],
                               g[:, :, 0]) + rb["cond"]["b"])[..., None]
            h = x + cond
            for c1, c2, d in zip(rb["convs1"], rb["convs2"], rb["dils"]):
                t = jnp.where(h > 0, h, LRELU_SLOPE * h)
                t = _ref_conv1d(t, c1["w"], c1["b"], dilation=d,
                                padding=((rb["k"] - 1) // 2) * d)
                t = jnp.where(t > 0, t, LRELU_SLOPE * t)
                t = _ref_conv1d(t, c2["w"], c2["b"], dilation=1,
                                padding=(rb["k"] - 1) // 2)
                h = h + t
            xs = h if xs is None else xs + h
        x = xs / num_kernels
    x = jnp.where(x > 0, x, 0.01 * x)
    x = _ref_conv1d(x, params["conv_post"]["w"], None, padding=3)
    return jnp.tanh(x)


# ----------------------------------------------------------------------------
if __name__ == "__main__":
    key = jax.random.PRNGKey(0)
    k_p, k_x, k_g = jax.random.split(key, 3)

    initial_channel = 8
    resblock_kernel_sizes = [3, 5]
    resblock_dilation_sizes = [[1, 2], [1, 2]]
    upsample_rates = [2, 2]
    upsample_kernel_sizes = [4, 4]
    upsample_initial_channel = 32
    gin_channels = 16
    B, T = 2, 256

    params = init_generator(k_p, initial_channel, resblock_kernel_sizes,
                            resblock_dilation_sizes, upsample_rates,
                            upsample_initial_channel, upsample_kernel_sizes,
                            gin_channels)

    x = jax.random.normal(k_x, (B, initial_channel, T), jnp.float32)
    g = jax.random.normal(k_g, (B, gin_channels, 1), jnp.float32)

    total_up = 1
    for u in upsample_rates:
        total_up *= u

    # Small tile target so the multi-tile / halo / edge-mask / partial-block
    # paths are exercised even at demo lengths; production uses the default.
    y_ref = generator_forward_ref(params, x, g)

    # Numerical validation of kernel indexing with f32 compute.
    y32 = generator_forward(params, x, g, compute_dtype=jnp.float32,
                            t_tile_target=256)
    jax.block_until_ready(y32)
    assert y32.shape == (B, 1, T * total_up), y32.shape
    err32 = float(jnp.max(jnp.abs(y32 - y_ref)))
    assert err32 < 1e-2, f"f32 path mismatch vs reference: {err32}"

    # Production (bf16) path: shape / finiteness / loose numerical sanity.
    y = generator_forward(params, x, g, t_tile_target=256)
    jax.block_until_ready(y)
    assert y.shape == (B, 1, T * total_up), y.shape
    assert bool(jnp.all(jnp.isfinite(y)))
    err_bf16 = float(jnp.max(jnp.abs(y.astype(jnp.float32) - y_ref)))
    assert err_bf16 < 0.25, f"bf16 path diverged from reference: {err_bf16}"

    print("KERNEL_OK")
</pallas_src>

<mosaic_0001>
module attributes {stable_mosaic.version = 11 : i64} {
  func.func @_k(%arg0: i32, %arg1: memref<8x128xf32, #tpu.memory_space<vmem>>, %arg2: memref<8x128xf32, #tpu.memory_space<vmem>>) attributes {dimension_semantics = [#tpu.dimension_semantics<arbitrary>], iteration_bounds = array<i64: 2>, scalar_prefetch = 0 : i64, scratch_operands = 0 : i64, tpu.core_type = #tpu.core_type<tc>, window_params = [{pipeline_mode = #tpu.pipeline_mode<synchronous>, transform_indices = @transform_0, window_bounds = array<i64: 8, 128>}, {pipeline_mode = #tpu.pipeline_mode<synchronous>, transform_indices = @transform_1, window_bounds = array<i64: 8, 128>}]} {
    %c0 = arith.constant 0 : index
    %c0_0 = arith.constant 0 : index
    %0 = vector.load %arg1[%c0, %c0_0] : memref<8x128xf32, #tpu.memory_space<vmem>>, vector<8x128xf32>
    %c0_1 = arith.constant 0 : index
    %c0_2 = arith.constant 0 : index
    %1 = vector.load %arg2[%c0_1, %c0_2] : memref<8x128xf32, #tpu.memory_space<vmem>>, vector<8x128xf32>
    tpu.vector_store %arg2[%c0_1, %c0_2], %0 {strides = array<i32>} : memref<8x128xf32, #tpu.memory_space<vmem>>, vector<8x128xf32>,
    return
  }
  func.func @transform_0(%arg0: i32) -> (i32, i32) {
    %c0_i32 = arith.constant 0 : i32
    %c0_i32_0 = arith.constant 0 : i32
    %c0_i32_1 = arith.constant 0 : i32
    return %c0_i32, %c0_i32_0 : i32, i32
  }
  func.func @transform_1(%arg0: i32) -> (i32, i32) {
    %c0_i32 = arith.constant 0 : i32
    %c0_i32_0 = arith.constant 0 : i32
    %c0_i32_1 = arith.constant 0 : i32
    return %c0_i32, %c0_i32_0 : i32, i32
  }
}

module attributes {stable_mosaic.version = 11 : i64} {
  func.func @_conv1d_kernel(%arg0: i32, %arg1: i32, %arg2: memref<1x8x128xf32, #tpu.memory_space<vmem>>, %arg3: memref<1x8x256xf32, #tpu.memory_space<vmem>>, %arg4: memref<1x8x128xf32, #tpu.memory_space<vmem>>, %arg5: memref<7x32x8xf32, #tpu.memory_space<vmem>>, %arg6: memref<32x1xf32, #tpu.memory_space<vmem>>, %arg7: memref<1x32x256xf32, #tpu.memory_space<vmem>>) attributes {dimension_semantics = [#tpu.dimension_semantics<parallel>, #tpu.dimension_semantics<parallel>], iteration_bounds = array<i64: 2, 1>, scalar_prefetch = 0 : i64, scratch_operands = 0 : i64, tpu.core_type = #tpu.core_type<tc>, window_params = [{transform_indices = @transform_0, window_bounds = array<i64: 1, 8, 128>}, {transform_indices = @transform_1, window_bounds = array<i64: 1, 8, 256>}, {transform_indices = @transform_2, window_bounds = array<i64: 1, 8, 128>}, {pipeline_mode = #tpu.pipeline_mode<synchronous>, transform_indices = @transform_3, window_bounds = array<i64: 7, 32, 8>}, {pipeline_mode = #tpu.pipeline_mode<synchronous>, transform_indices = @transform_4, window_bounds = array<i64: 32, 1>}, {transform_indices = @transform_5, window_bounds = array<i64: 1, 32, 256>}]} {
    %c0 = arith.constant 0 : index
    %c0_0 = arith.constant 0 : index
    %c0_1 = arith.constant 0 : index
    %0 = vector.load %arg2[%c0, %c0_0, %c0_1] : memref<1x8x128xf32, #tpu.memory_space<vmem>>, vector<1x8x128xf32>
    %1 = vector.shape_cast %0 : vector<1x8x128xf32> to vector<8x128xf32>
    %c0_2 = arith.constant 0 : index
    %c0_3 = arith.constant 0 : index
    %c0_4 = arith.constant 0 : index
    %2 = vector.load %arg3[%c0_2, %c0_3, %c0_4] : memref<1x8x256xf32, #tpu.memory_space<vmem>>, vector<1x8x256xf32>
    %3 = vector.shape_cast %2 : vector<1x8x256xf32> to vector<8x256xf32>
    %c0_5 = arith.constant 0 : index
    %c0_6 = arith.constant 0 : index
    %c0_7 = arith.constant 0 : index
    %4 = vector.load %arg4[%c0_5, %c0_6, %c0_7] : memref<1x8x128xf32, #tpu.memory_space<vmem>>, vector<1x8x128xf32>
    %5 = vector.shape_cast %4 : vector<1x8x128xf32> to vector<8x128xf32>
    %6 = tpu.concatenate %1, %3, %5 in 1 : vector<8x128xf32>, vector<8x256xf32>, vector<8x128xf32> -> vector<8x512xf32>
    %c256_i32 = arith.constant 256 : i32
    %7 = arith.muli %arg1, %c256_i32 : i32
    %c128_i32 = arith.constant 128 : i32
    %8 = arith.subi %7, %c128_i32 : i32
    %9 = tpu.iota {dimensions = array<i32: 1>} : vector<1x512xi32>
    %10 = vector.broadcast %8 : i32 to vector<1x512xi32>
    %11 = arith.addi %9, %10 : vector<1x512xi32>
    %c0_i32 = arith.constant 0 : i32
    %12 = vector.broadcast %c0_i32 : i32 to vector<1x512xi32>
    %13 = arith.cmpi sge, %11, %12 : vector<1x512xi32>
    %c256_i32_8 = arith.constant 256 : i32
    %14 = vector.broadcast %c256_i32_8 : i32 to vector<1x512xi32>
    %15 = arith.cmpi slt, %11, %14 : vector<1x512xi32>
    %16 = arith.andi %13, %15 : vector<1x512xi1>
    %c0_i32_9 = arith.constant 0 : i32
    %17 = arith.sitofp %c0_i32_9 : i32 to f32
    %18 = vector.shape_cast %16 : vector<1x512xi1> to vector<1x512xi1>
    %19 = vector.broadcast %18 : vector<1x512xi1> to vector<8x512xi1>
    %20 = vector.broadcast %17 : f32 to vector<8x512xf32>
    %21 = arith.select %19, %6, %20 : vector<8x512xi1>, vector<8x512xf32>
    %c0_10 = arith.constant 0 : index
    %c0_11 = arith.constant 0 : index
    %c0_12 = arith.constant 0 : index
    %22 = vector.load %arg5[%c0_10, %c0_11, %c0_12] : memref<7x32x8xf32, #tpu.memory_space<vmem>>, vector<1x32x8xf32>
    %23 = vector.shape_cast %22 : vector<1x32x8xf32> to vector<32x8xf32>
    %24 = vector.extract_strided_slice %21 {offsets = [0, 125], sizes = [8, 256], strides = [1, 1]} : vector<8x512xf32> to vector<8x256xf32>
    %cst = arith.constant dense<0.000000e+00> : vector<32x256xf32>
    %25 = tpu.matmul %23, %24, %cst {dimension_numbers = #tpu.dot_dimension_numbers<[1], [0], [0], [1], [0, 0, 1, 1], [], []>} : vector<32x8xf32>, vector<8x256xf32>, vector<32x256xf32> -> vector<32x256xf32>
    %c1 = arith.constant 1 : index
    %c0_13 = arith.constant 0 : index
    %c0_14 = arith.constant 0 : index
    %26 = vector.load %arg5[%c1, %c0_13, %c0_14] : memref<7x32x8xf32, #tpu.memory_space<vmem>>, vector<1x32x8xf32>
    %27 = vector.shape_cast %26 : vector<1x32x8xf32> to vector<32x8xf32>
    %28 = vector.extract_strided_slice %21 {offsets = [0, 126], sizes = [8, 256], strides = [1, 1]} : vector<8x512xf32> to vector<8x256xf32>
    %cst_15 = arith.constant dense<0.000000e+00> : vector<32x256xf32>
    %29 = tpu.matmul %27, %28, %cst_15 {dimension_numbers = #tpu.dot_dimension_numbers<[1], [0], [0], [1], [0, 0, 1, 1], [], []>} : vector<32x8xf32>, vector<8x256xf32>, vector<32x256xf32> -> vector<32x256xf32>
    %30 = arith.addf %25, %29 : vector<32x256xf32>
    %c2 = arith.constant 2 : index
    %c0_16 = arith.constant 0 : index
    %c0_17 = arith.constant 0 : index
    %31 = vector.load %arg5[%c2, %c0_16, %c0_17] : memref<7x32x8xf32, #tpu.memory_space<vmem>>, vector<1x32x8xf32>
    %32 = vector.shape_cast %31 : vector<1x32x8xf32> to vector<32x8xf32>
    %33 = vector.extract_strided_slice %21 {offsets = [0, 127], sizes = [8, 256], strides = [1, 1]} : vector<8x512xf32> to vector<8x256xf32>
    %cst_18 = arith.constant dense<0.000000e+00> : vector<32x256xf32>
    %34 = tpu.matmul %32, %33, %cst_18 {dimension_numbers = #tpu.dot_dimension_numbers<[1], [0], [0], [1], [0, 0, 1, 1], [], []>} : vector<32x8xf32>, vector<8x256xf32>, vector<32x256xf32> -> vector<32x256xf32>
    %35 = arith.addf %30, %34 : vector<32x256xf32>
    %c3 = arith.constant 3 : index
    %c0_19 = arith.constant 0 : index
    %c0_20 = arith.constant 0 : index
    %36 = vector.load %arg5[%c3, %c0_19, %c0_20] : memref<7x32x8xf32, #tpu.memory_space<vmem>>, vector<1x32x8xf32>
    %37 = vector.shape_cast %36 : vector<1x32x8xf32> to vector<32x8xf32>
    %38 = vector.extract_strided_slice %21 {offsets = [0, 128], sizes = [8, 256], strides = [1, 1]} : vector<8x512xf32> to vector<8x256xf32>
    %cst_21 = arith.constant dense<0.000000e+00> : vector<32x256xf32>
    %39 = tpu.matmul %37, %38, %cst_21 {dimension_numbers = #tpu.dot_dimension_numbers<[1], [0], [0], [1], [0, 0, 1, 1], [], []>} : vector<32x8xf32>, vector<8x256xf32>, vector<32x256xf32> -> vector<32x256xf32>
    %40 = arith.addf %35, %39 : vector<32x256xf32>
    %c4 = arith.constant 4 : index
    %c0_22 = arith.constant 0 : index
    %c0_23 = arith.constant 0 : index
    %41 = vector.load %arg5[%c4, %c0_22, %c0_23] : memref<7x32x8xf32, #tpu.memory_space<vmem>>, vector<1x32x8xf32>
    %42 = vector.shape_cast %41 : vector<1x32x8xf32> to vector<32x8xf32>
    %43 = vector.extract_strided_slice %21 {offsets = [0, 129], sizes = [8, 256], strides = [1, 1]} : vector<8x512xf32> to vector<8x256xf32>
    %cst_24 = arith.constant dense<0.000000e+00> : vector<32x256xf32>
    %44 = tpu.matmul %42, %43, %cst_24 {dimension_numbers = #tpu.dot_dimension_numbers<[1], [0], [0], [1], [0, 0, 1, 1], [], []>} : vector<32x8xf32>, vector<8x256xf32>, vector<32x256xf32> -> vector<32x256xf32>
    %45 = arith.addf %40, %44 : vector<32x256xf32>
    %c5 = arith.constant 5 : index
    %c0_25 = arith.constant 0 : index
    %c0_26 = arith.constant 0 : index
    %46 = vector.load %arg5[%c5, %c0_25, %c0_26] : memref<7x32x8xf32, #tpu.memory_space<vmem>>, vector<1x32x8xf32>
    %47 = vector.shape_cast %46 : vector<1x32x8xf32> to vector<32x8xf32>
    %48 = vector.extract_strided_slice %21 {offsets = [0, 130], sizes = [8, 256], strides = [1, 1]} : vector<8x512xf32> to vector<8x256xf32>
    %cst_27 = arith.constant dense<0.000000e+00> : vector<32x256xf32>
    %49 = tpu.matmul %47, %48, %cst_27 {dimension_numbers = #tpu.dot_dimension_numbers<[1], [0], [0], [1], [0, 0, 1, 1], [], []>} : vector<32x8xf32>, vector<8x256xf32>, vector<32x256xf32> -> vector<32x256xf32>
    %50 = arith.addf %45, %49 : vector<32x256xf32>
    %c6 = arith.constant 6 : index
    %c0_28 = arith.constant 0 : index
    %c0_29 = arith.constant 0 : index
    %51 = vector.load %arg5[%c6, %c0_28, %c0_29] : memref<7x32x8xf32, #tpu.memory_space<vmem>>, vector<1x32x8xf32>
    %52 = vector.shape_cast %51 : vector<1x32x8xf32> to vector<32x8xf32>
    %53 = vector.extract_strided_slice %21 {offsets = [0, 131], sizes = [8, 256], strides = [1, 1]} : vector<8x512xf32> to vector<8x256xf32>
    %cst_30 = arith.constant dense<0.000000e+00> : vector<32x256xf32>
    %54 = tpu.matmul %52, %53, %cst_30 {dimension_numbers = #tpu.dot_dimension_numbers<[1], [0], [0], [1], [0, 0, 1, 1], [], []>} : vector<32x8xf32>, vector<8x256xf32>, vector<32x256xf32> -> vector<32x256xf32>
    %55 = arith.addf %50, %54 : vector<32x256xf32>
    %c0_31 = arith.constant 0 : index
    %c0_32 = arith.constant 0 : index
    %56 = vector.load %arg6[%c0_31, %c0_32] : memref<32x1xf32, #tpu.memory_space<vmem>>, vector<32x1xf32>
    %57 = vector.broadcast %56 : vector<32x1xf32> to vector<32x256xf32>
    %58 = arith.addf %55, %57 : vector<32x256xf32>
    %c0_33 = arith.constant 0 : index
    %c0_34 = arith.constant 0 : index
    %c0_35 = arith.constant 0 : index
    %59 = vector.load %arg7[%c0_33, %c0_34, %c0_35] : memref<1x32x256xf32, #tpu.memory_space<vmem>>, vector<1x32x256xf32>
    %60 = vector.shape_cast %59 : vector<1x32x256xf32> to vector<32x256xf32>
    %61 = vector.shape_cast %58 : vector<32x256xf32> to vector<1x32x256xf32>
    tpu.vector_store %arg7[%c0_33, %c0_34, %c0_35], %61 {strides = array<i32>} : memref<1x32x256xf32, #tpu.memory_space<vmem>>, vector<1x32x256xf32>,
    return
  }
  func.func @transform_0(%arg0: i32, %arg1: i32) -> (i32, i32, i32) {
    %c2_i32 = arith.constant 2 : i32
    %0 = arith.muli %arg1, %c2_i32 : i32
    %c1_i32 = arith.constant 1 : i32
    %1 = arith.subi %0, %c1_i32 : i32
    %c0_i32 = arith.constant 0 : i32
    %c1_i32_0 = arith.constant 1 : i32
    %2 = arith.maxsi %c0_i32, %1 : i32
    %3 = arith.minsi %c1_i32_0, %2 : i32
    %c0_i32_1 = arith.constant 0 : i32
    %c0_i32_2 = arith.constant 0 : i32
    return %arg0, %c0_i32_1, %3 : i32, i32, i32
  }
  func.func @transform_1(%arg0: i32, %arg1: i32) -> (i32, i32, i32) {
    %c0_i32 = arith.constant 0 : i32
    %0 = arith.minsi %arg1, %c0_i32 : i32
    %c0_i32_0 = arith.constant 0 : i32
    %c0_i32_1 = arith.constant 0 : i32
    return %arg0, %c0_i32_0, %0 : i32, i32, i32
  }
  func.func @transform_2(%arg0: i32, %arg1: i32) -> (i32, i32, i32) {
    %c1_i32 = arith.constant 1 : i32
    %0 = arith.addi %arg1, %c1_i32 : i32
    %c2_i32 = arith.constant 2 : i32
    %1 = arith.muli %0, %c2_i32 : i32
    %c0_i32 = arith.constant 0 : i32
    %c1_i32_0 = arith.constant 1 : i32
    %2 = arith.maxsi %c0_i32, %1 : i32
    %3 = arith.minsi %c1_i32_0, %2 : i32
    %c0_i32_1 = arith.constant 0 : i32
    %c0_i32_2 = arith.constant 0 : i32
    return %arg0, %c0_i32_1, %3 : i32, i32, i32
  }
  func.func @transform_3(%arg0: i32, %arg1: i32) -> (i32, i32, i32) {
    %c0_i32 = arith.constant 0 : i32
    %c0_i32_0 = arith.constant 0 : i32
    %c0_i32_1 = arith.constant 0 : i32
    %c0_i32_2 = arith.constant 0 : i32
    return %c0_i32, %c0_i32_0, %c0_i32_1 : i32, i32, i32
  }
  func.func @transform_4(%arg0: i32, %arg1: i32) -> (i32, i32) {
    %c0_i32 = arith.constant 0 : i32
    %c0_i32_0 = arith.constant 0 : i32
    %c0_i32_1 = arith.constant 0 : i32
    return %c0_i32, %c0_i32_0 : i32, i32
  }
  func.func @transform_5(%arg0: i32, %arg1: i32) -> (i32, i32, i32) {
    %c0_i32 = arith.constant 0 : i32
    %c0_i32_0 = arith.constant 0 : i32
    return %arg0, %c0_i32, %arg1 : i32, i32, i32
  }
}

</mosaic_0001>

<bundles_post_ra>
// kernel: tpu_custom_call.1
= control target key start
LH: loop header
LB: loop body
LE: loop exit
PB: predicated region body
PF: predicated region fallthrough
CT: control target
= control target key end

     0   :  { %6 = vsyncpa [#allocation3], 0  ;;  %s286_s0 = inlined_call_operand.hbm [shape: f32[8,128], index: 0, kind: input, shape index: {}]   ;;  %s287_s1 = inlined_call_operand.hbm [shape: f32[8,128], index: 1, kind: output, shape index: {}]  }
   0x1   :  { %7 = vsyncpa [#allocation4], 0  ;;  %s269_s6 = smov 0  }
   0x2 LB: > { %s148_s7 = sadd.s32 4294967295, %s255_s6   ;;  %p149_p0 = scmp.ge.s32.totalorder %s255_s6, 1  ;;  %s255_s6 = sphi %s269_s6, %s13_s6  }
   0x3   : > { %p60_p1 = scmp.lt.s32.totalorder %s255_s6, 3  ;;  %s72_s10 = sshll.u32 %s286_s0, 4  ;;  %s73_s10 = int_to_ptr.hbm [resolvable:$true] %s72_s10 }
   0x4   : > { %p169_p3 = scmp.eq.s32.totalorder %s148_s7, 0  ;;  %s257_s11 = smov [#allocation2]  }
   0x5   : > { %p61_p2 = pnand %p149_p0, %p60_p1  ;;  %s74_s12 = sshll.u32 %s257_s11, 4  ;;  %s75_s12 = int_to_ptr.vmem [resolvable:$true] %s74_s12 }
   0x7   : > { %p165_p4 = pneg %p61_p2  ;;  %87 = sbr.rel (%p61_p2) target bundleno = 19 (0x13), region = 24 }
   0x9   : > { %p166_p5 = pnand %p169_p3, %p165_p4 }
   0xb   : > { %168 = dma.hbm_to_vmem [thread:$0]  (!%p166_p5), %s73_s10, 128, %s75_s12, [#allocation3]  }
   0xc   : > { %246 = dma.done.wait (%p169_p3), [#allocation3], 128  }
   0xd   : > { %248 = vsyncadd (%p169_p3), [#allocation3], 4294967168  ;;  %s258_s13 = smov [#allocation5]   ;;  %s108_s17 = sshll.u32 %s287_s1, 4  ;;  %v98_v0 = vld [vmem:[#allocation2] sm:$0xff]  ;;  %s109_s17 = int_to_ptr.hbm [resolvable:$true] %s108_s17 }
   0xe   : > { %s106_s14 = sshll.u32 %s258_s13, 4  ;;  %p171_p6 = scmp.eq.s32.totalorder %s148_s7, 1  ;;  %99 = vst [vmem:[#allocation5] sm:$0xff] %v98_v0  ;;  %s107_s14 = int_to_ptr.vmem [resolvable:$true] %s106_s14 }
  0x10   : > { %162 = dma.vmem_to_hbm [thread:$0]  (%p171_p6), %s107_s14, 128, %s109_s17, [#allocation4]  }
  0x11   : > { %250 = dma.done.wait (%p171_p6), [#allocation4], 128  }
  0x12   : > { %252 = vsyncadd (%p171_p6), [#allocation4], 4294967168 }
  0x13 PF: > { %s13_s6 = sadd.s32 1, %s255_s6  }
  0x14   : > { %p10_p7 = scmp.ge.s32.totalorder %s13_s6, 4  }
  0x16   :  { %12 = sbr.rel (!%p10_p7) target bundleno = 2 (0x2), region = 53 }
  0x1b   :  { %122 = vsyncpa [#allocation3], 1 }
  0x1c   :  { %124 = vsyncpa [#allocation3 + $0x1], 1 }
  0x1d   :  { %125 = vsyncpa [#allocation4], 1 }
  0x1e   :  { %127 = vsyncpa [#allocation4 + $0x1], 1 }

// kernel: tpu_custom_call.1
= control target key start
LH: loop header
LB: loop body
LE: loop exit
PB: predicated region body
PF: predicated region fallthrough
CT: control target
= control target key end

     0   :  { %10 = vsyncpa [#allocation3], 0  ;;  %s1887_s0 = inlined_call_operand.vmem [shape: f32[2,8,256], index: 0, kind: input, shape index: {}]   ;;  %s1888_s1 = inlined_call_operand.vmem [shape: f32[2,8,256], index: 1, kind: input, shape index: {}]   ;;  %s1889_s2 = inlined_call_operand.vmem [shape: f32[2,8,256], index: 2, kind: input, shape index: {}]   ;;  %s1890_s3 = inlined_call_operand.vmem [shape: f32[7,32,8], index: 3, kind: input, shape index: {}]   ;;  %s1891_s4 = inlined_call_operand.vmem [shape: f32[32,1], index: 4, kind: input, shape index: {}]   ;;  %s1892_s5 = inlined_call_operand.hbm [shape: f32[2,32,256], index: 5, kind: output, shape index: {}]  }
   0x1   :  { %12 = vsyncpa [#allocation3 + $0x1], 0  ;;  %s1584_s18 = smov 0   ;;  %s1586_s0 = smov 0  }
   0x2   :  { %s1588_s19 = smov 0   ;;  %s1590_s20 = smov 0  }
   0x3   :  { %s1592_s2 = smov 0   ;;  %s1594_s21 = smov 0  }
   0x4 LB: > { %s1262_s22 = sadd.s32 4294967295, %s1542_s21   ;;  %s1263_s23 = sadd.s32 4294967294, %s1542_s21   ;;  %s1542_s21 = sphi %s1594_s21, %s18_s21   ;;  %s1538_s2 = sphi %s1592_s2, %s1899_s2   ;;  %s1534_s20 = sphi %s1590_s20, %s1898_s20   ;;  %s1530_s19 = sphi %s1588_s19, %s1897_s19   ;;  %s1526_s0 = sphi %s1586_s0, %s1896_s0   ;;  %s1522_s18 = sphi %s1584_s18, %s1895_s18  }
   0x5   : > { %s30_s24 = sadd.s32 1, %s1538_s2  ;;  %s193_s25 = sadd.s32 1, %s1530_s19 }
   0x6   : > { %p32_p0 = scmp.ge.s32.totalorder %s30_s24, 2  ;;  %p203_p1 = scmp.ne.s32.totalorder %s1530_s19, %s1526_s0 }
   0x7   : > { %p204_p2 = scmp.eq.s32.totalorder %s1262_s22, 1  ;;  %p209_p3 = scmp.ne.s32.totalorder %s1526_s0, %s1522_s18 }
   0x8   : > { %s1901_s24 = smov (%p32_p0, %s30_s24), 0  ;;  %p210_p5 = scmp.eq.s32.totalorder %s1263_s23, 1 }
   0x9   : > { %p1624_p4 = por %p204_p2, %p203_p1  ;;  %s188_s27 = ssub.s32 %s1538_s2, %s1901_s24 }
   0xa   : > { %p1266_p6 = scmp.ge.s32.totalorder %s1542_s21, 1  ;;  %p191_p7 = scmp.eq.s32.totalorder %s188_s27, 0 }
   0xb   : > { %p1631_p8 = por %p210_p5, %p209_p3  ;;  %p297_p9 = scmp.lt.s32.totalorder %s1542_s21, 3 }
   0xc   : > { %s1637_s29 = scalar_select %p191_p7, %s1530_s19, %s193_s25  }
   0xd   : > { %p298_p10 = pnand %p1266_p6, %p297_p9 }
   0xe   : > { %p382_p11 = scmp.lt.s32.totalorder (!%p298_p10), %s1534_s20, 1  ;;  %s1545_s10 = smov (!%p298_p10), 3  }
   0xf   : > { %301 = sbr.rel (%p298_p10) target bundleno = 398 (0x18e), region = 40  ;;  %s1546_s11 = smov (!%p298_p10), 2  }
  0x10   : > { %s1547_s12 = smov (!%p298_p10), 1   ;;  %s1548_s13 = smov (!%p298_p10), 127  }
  0x11   : > { %s1549_s14 = smov (!%p298_p10), 126   ;;  %s1550_s15 = smov (!%p298_p10), 125  }
  0x12   : > { %s1484_s8 = scalar_lea.hbm (!%p298_p10), %s1892_s5, 128 }
  0x14   : > { %s383_s30 = scalar_select %p382_p11, %s1534_s20, 1  ;;  %v1544_v1 = vmov 0.0   ;;  %vm472_vm0 = vcmask 15360   ;;  %vm554_vm1 = vcmask 23552   ;;  %vm640_vm2 = vcmask 7168   ;;  %v1276_v14 = vld [vmem:[%s1890_s3 + $0x30] sm:$0xff] }
  0x15   : > { %vm477_vm3 = vcmask 64512   ;;  %v1274_v15 = vld [vmem:[%s1890_s3 + $0x20] sm:$0xff]  ;;  %v1277_v25 = vld [vmem:[%s1890_s3 + $0x38] sm:$0xff]  ;;  %v1275_v26 = vld [vmem:[%s1890_s3 + $0x28] sm:$0xff]  ;;  %vm818_vm4 = vcmask 1039360   ;;  %vm912_vm5 = vcmask 1031168  }
  0x16   : > { %s1360_s6 = sshll.u32 %s383_s30, 4  ;;  %v454_v31 = vld [vmem:[%s1890_s3] sm:$0xff]  ;;  %v455_v39 = vld [vmem:[%s1890_s3 + $0x8] sm:$0xff]  ;;  %vm1006_vm6 = vcmask 1022976   ;;  %v456_v48 = vld [vmem:[%s1890_s3 + $0x10] sm:$0xff]  ;;  %v1551_v60 = vmov 0  }
  0x17   : > { %s389_s9 = scalar_lea.vmem %s1888_s1, %s1360_s6  ;;  %v1294_v32 = vld [vmem:[%s1890_s3 + $0x40] sm:$0xff]  ;;  %v1295_v40 = vld [vmem:[%s1890_s3 + $0x48] sm:$0xff]  ;;  %v1296_v49 = vld [vmem:[%s1890_s3 + $0x50] sm:$0xff]  ;;  %1461 = vset.pattern.permute.xlu0 %v1551_v60  ;;  %1462 = vset.pattern.permute.xlu1 %v1551_v60 }
  0x18   : > { %v415_v0 = vld [vmem:[%s389_s9] sm:$0xff]  ;;  %v416_v3 = vld [vmem:[%s389_s9 + $0x8] sm:$0xff]  ;;  %v457_v51 = vld [vmem:[%s1890_s3 + $0x18] sm:$0xff]  ;;  %1463 = vset.pattern.permute.xlu2 %v1551_v60 }
  0x19   : > { %v1436_v2 = vpack.i.bf16 %v415_v0, %v1544_v1  ;;  %v1446_v4 = vpack.i.bf16 %v416_v3, %v415_v0  ;;  %v1297_v52 = vld [vmem:[%s1890_s3 + $0x58] sm:$0xff]  ;;  %v1306_v53 = vld [vmem:[%s1890_s3 + $0x60] sm:$0xff]  ;;  %v1307_v55 = vld [vmem:[%s1890_s3 + $0x68] sm:$0xff] }
  0x1a   : > { %v1318_v54 = vld [vmem:[%s1890_s3 + $0x80] sm:$0xff]  ;;  %v1319_v56 = vld [vmem:[%s1890_s3 + $0x88] sm:$0xff]  ;;  %v1308_v57 = vld [vmem:[%s1890_s3 + $0x70] sm:$0xff] }
  0x1b   : > { %1437 = vrot.lane.b32.xlu1 %v1436_v2, %s1545_s10  ;;  %1432 = vrot.lane.b32.xlu0 %v1436_v2, %s1546_s11  ;;  %v1320_v58 = vld [vmem:[%s1890_s3 + $0x90] sm:$0xff]  ;;  %v1089_v59 = vld [vmem:[%s1891_s4] sm:$0xff] }
  0x1c   : > { %1442 = vrot.lane.b32.xlu2 %v1436_v2, %s1547_s12  ;;  %v1309_v61 = vld [vmem:[%s1890_s3 + $0x78] sm:$0xff]  ;;  %v1090_v63 = vld [vmem:[%s1891_s4 + $0x8] sm:$0xff] }
  0x1d   : > { %v1321_v62 = vld [vmem:[%s1890_s3 + $0x98] sm:$0xff] }
  0x1e   : > { %v1092_v2 = vld [vmem:[%s1891_s4 + $0x18] sm:$0xff] }
  0x23   : > { %552 = vrot.lane.b32.xlu1 %v416_v3, %s1545_s10  ;;  %470 = vrot.lane.b32.xlu0 %v416_v3, %s1546_s11 }
  0x24   : > { %638 = vrot.lane.b32.xlu2 %v416_v3, %s1547_s12  ;;  %s356_s12 = sand.u32 1, %s1526_s0  }
  0x25   : > { %s1130_s25 = scalar_lea.sflag [#allocation3], %s356_s12 }
  0x2b   : > { %1447 = vrot.lane.b32.xlu0 %v1446_v4, %s1548_s13  ;;  %816 = vrot.lane.b32.xlu1 %v1544_v1, %s1548_s13  ;;  %s1267_s13 = sshll.u32 %s356_s12, 6 }
  0x2c   : > { %1452 = vrot.lane.b32.xlu2 %v1446_v4, %s1549_s14 }
  0x33   : > { %910 = vrot.lane.b32.xlu0 %v1544_v1, %s1549_s14  ;;  %1457 = vrot.lane.b32.xlu1 %v1446_v4, %s1550_s15  ;;  %v1343_v4 = vld [vmem:[%s1890_s3 + $0xc8] sm:$0xff]  ;;  %s1827_s14 = scalar_lea.vmem [#allocation2], %s1267_s13 }
  0x34   : > { %1004 = vrot.lane.b32.xlu2 %v1544_v1, %s1550_s15  ;;  %v1342_v1 = vld [vmem:[%s1890_s3 + $0xc0] sm:$0xff]  ;;  %s1363_s15 = sshll.u32 %s1534_s20, 6  ;;  %s1144_s23 = sshll.u32 %s1827_s14, 4  ;;  %s1145_s23 = int_to_ptr.vmem [resolvable:$true] %s1144_s23 }
  0x35   : > { %s1143_s22 = scalar_lea.hbm %s1892_s5, %s1363_s15 }
  0x36   : > { %s1146_s20 = sshll.u32 %s1143_s22, 4  ;;  %s1147_s20 = int_to_ptr.hbm [resolvable:$true] %s1146_s20 }
  0x37   : > { %s1478_s27 = sshra.s32 %s1147_s20, 4  ;;  %s1479_s27 = int_to_ptr.hbm [resolvable:$true] %s1478_s27 }
  0x38   : > { %s1480_s30 = scalar_lea.hbm %s1479_s27, 64  ;;  %p1485_p1 = scmp.lt.s32.totalorder %s1479_s27, %s1892_s5 }
  0x39   : > { %p1481_p12 = scmp.ne.s32.totalorder %s1479_s27, %s1480_s30  ;;  %p1486_p2 = scmp.lt.s32.totalorder %s1484_s8, %s1480_s30 }
  0x3b   : > { %1095 = vperm.xlu0 %1461, %v1089_v59   ;;  %1100 = vperm.xlu1 %1462, %v1090_v63   ;;  %p1482_p13 = pnand %p1481_p12, %p1624_p4  ;;  %p1487_p3 = por %p1486_p2, %p1485_p1 }
  0x3d   : > { %p1483_p0 = pneg %p1482_p13 }
  0x3f   : > { %p1488_p5 = pnand %p1487_p3, %p1483_p0 }
  0x43   : > { %1110 = vperm.xlu1 %1462, %v1092_v2  }
  0x76   : > { %v1443_v5 = vpop.permute.xlu2 %1442 }
  0x77   : > { %v1445_v6 = vunpack.i.h.bf16 %v1443_v5  ;;  %v1444_v7 = vunpack.i.l.bf16 %v1443_v5  ;;  %v1332_v5 = vld [vmem:[%s1890_s3 + $0xb0] sm:$0xff] }
  0x79   : > { %v641_v18 = vsel %vm640_vm2, %v1444_v7, %v1445_v6  ;;  %v1333_v7 = vld [vmem:[%s1890_s3 + $0xb8] sm:$0xff] }
  0x7e   : > { %v639_v19 = vpop.permute.xlu2 %638 }
  0x7f   : > { %v642_v22 = vsel %vm640_vm2, %v1445_v6, %v639_v19  ;;  %v1344_v6 = vld [vmem:[%s1890_s3 + $0xd0] sm:$0xff] }
  0x86   : > { %v1453_v35 = vpop.permute.xlu2 %1452 }
  0x87   : > { %v1455_v36 = vunpack.i.h.bf16 %v1453_v35  ;;  %v1454_v37 = vunpack.i.l.bf16 %v1453_v35 }
  0x89   : > { %v913_v42 = vsel %vm912_vm5, %v1454_v37, %v1455_v36 }
  0x8d   : > { %v1438_v8 = vpop.permute.xlu1 %1437  ;;  %v1433_v9 = vpop.permute.xlu0 %1432 }
  0x8e   : > { %v1440_v10 = vunpack.i.h.bf16 %v1438_v8  ;;  %v1439_v11 = vunpack.i.l.bf16 %v1438_v8  ;;  %v1435_v12 = vunpack.i.h.bf16 %v1433_v9  ;;  %v1434_v13 = vunpack.i.l.bf16 %v1433_v9  ;;  %v1005_v44 = vpop.permute.xlu2 %1004  ;;  %v1345_v8 = vld [vmem:[%s1890_s3 + $0xd8] sm:$0xff]  ;;  %v1091_v9 = vld [vmem:[%s1891_s4 + $0x10] sm:$0xff] }
  0x8f   : > { %1105 = vperm.xlu2 %1463, %v1091_v9  }
  0x90   : > { %v473_v16 = vsel %vm472_vm0, %v1434_v13, %v1435_v12  ;;  %v555_v17 = vsel %vm554_vm1, %v1439_v11, %v1440_v10 }
  0x91   : > { %505 = vmatpush.msra.mxu0 %v473_v16  ;;  %1364 = vmatpush.msra.mxu2 %v473_v16 }
  0x92   : > { %1280 = vmatmul.msk.f32.vlgmr.msra.gmra.mxu2 %vm477_vm3, %v1276_v14  ;;  %1278 = vmatmul.msk.f32.vlgmr.msra.gmra.mxu0 %vm477_vm3, %v1274_v15 }
  0x93   : > { %586 = vmatpush.msrb.mxu2 %v555_v17  ;;  %672 = vmatpush.msrb.mxu0 %v641_v18 }
  0x95   : > { %755 = vmatpush.msra.mxu2 %v415_v0  ;;  %v553_v20 = vpop.permute.xlu1 %552  ;;  %v471_v21 = vpop.permute.xlu0 %470  ;;  %v1330_v0 = vld [vmem:[%s1890_s3 + $0xa0] sm:$0xff] }
  0x96   : > { %v474_v23 = vsel %vm472_vm0, %v1435_v12, %v471_v21  ;;  %v556_v24 = vsel %vm554_vm1, %v1440_v10, %v553_v20 }
  0x97   : > { %534 = vmatpush.msra.mxu1 %v474_v23  ;;  %1365 = vmatpush.msra.mxu3 %v474_v23 }
  0x98   : > { %1284 = vmatmul.msk.f32.vlgmr.msra.gmra.mxu3 %vm477_vm3, %v1276_v14  ;;  %1282 = vmatmul.msk.f32.vlgmr.msra.gmra.mxu1 %vm477_vm3, %v1274_v15 }
  0x99   : > { %701 = vmatpush.msrb.mxu1 %v642_v22  ;;  %615 = vmatpush.msrb.mxu3 %v556_v24 }
  0x9a   : > { %1281 = vmatmul.msk.f32.gmra.mxu2 %vm477_vm3, %v1277_v25  ;;  %1279 = vmatmul.msk.f32.gmra.mxu0 %vm477_vm3, %v1275_v26 }
  0x9b   : > { %784 = vmatpush.msra.mxu3 %v416_v3  ;;  %v1331_v3 = vld [vmem:[%s1890_s3 + $0xa8] sm:$0xff] }
  0x9d   : > { %v1448_v27 = vpop.permute.xlu0 %1447  ;;  %v817_v28 = vpop.permute.xlu1 %816 }
  0x9e   : > { %v1450_v29 = vunpack.i.h.bf16 %v1448_v27  ;;  %v1449_v30 = vunpack.i.l.bf16 %v1448_v27 }
  0xa0   : > { %1285 = vmatmul.msk.f32.gmra.mxu3 %vm477_vm3, %v1277_v25  ;;  %v820_v33 = vsel %vm818_vm4, %v1450_v29, %v817_v28  ;;  %v819_v34 = vsel %vm818_vm4, %v1449_v30, %v1450_v29  ;;  %1283 = vmatmul.msk.f32.gmra.mxu1 %vm477_vm3, %v1275_v26 }
  0xa1   : > { %850 = vmatpush.msra.mxu0 %v819_v34  ;;  %879 = vmatpush.msra.mxu1 %v820_v33 }
  0xa2   : > { %1286 = vmatmul.msk.f32.vlgmr.msrb.gmra.mxu2 %vm477_vm3, %v454_v31  ;;  %1298 = vmatmul.msk.f32.vlgmr.msrb.gmra.mxu0 %vm477_vm3, %v1294_v32 }
  0xa3   : > { %944 = vmatpush.msrb.mxu2 %v913_v42 }
  0xa5   : > { %v911_v38 = vpop.permute.xlu0 %910  ;;  %v1458_v43 = vpop.permute.xlu1 %1457 }
  0xa6   : > { %v914_v41 = vsel %vm912_vm5, %v1455_v36, %v911_v38  ;;  %v1460_v45 = vunpack.i.h.bf16 %v1458_v43  ;;  %v1459_v46 = vunpack.i.l.bf16 %v1458_v43 }
  0xa8   : > { %1290 = vmatmul.msk.f32.vlgmr.msrb.gmra.mxu3 %vm477_vm3, %v454_v31  ;;  %1302 = vmatmul.msk.f32.vlgmr.msrb.gmra.mxu1 %vm477_vm3, %v1294_v32  ;;  %v1008_v47 = vsel %vm1006_vm6, %v1460_v45, %v1005_v44  ;;  %v1007_v50 = vsel %vm1006_vm6, %v1459_v46, %v1460_v45 }
  0xa9   : > { %973 = vmatpush.msrb.mxu3 %v914_v41  ;;  %1067 = vmatpush.msrb.mxu1 %v1008_v47 }
  0xaa   : > { %1287 = vmatmul.msk.f32.gmra.mxu2 %vm477_vm3, %v455_v39  ;;  %1299 = vmatmul.msk.f32.gmra.mxu0 %vm477_vm3, %v1295_v40 }
  0xab   : > { %1038 = vmatpush.msrb.mxu0 %v1007_v50 }
  0xad   : > { %v1096_v63 = vpop.permute.xlu0 %1095 }
  0xb0   : > { %1291 = vmatmul.msk.f32.gmra.mxu3 %vm477_vm3, %v455_v39  ;;  %1303 = vmatmul.msk.f32.gmra.mxu1 %vm477_vm3, %v1295_v40 }
  0xb2   : > { %1288 = vmatmul.msk.f32.gmra.mxu2 %vm477_vm3, %v456_v48  ;;  %1300 = vmatmul.msk.f32.gmra.mxu0 %vm477_vm3, %v1296_v49 }
  0xb8   : > { %1292 = vmatmul.msk.f32.gmra.mxu3 %vm477_vm3, %v456_v48  ;;  %1304 = vmatmul.msk.f32.gmra.mxu1 %vm477_vm3, %v1296_v49 }
  0xba   : > { %1289 = vmatmul.msk.f32.gmra.mxu2 %vm477_vm3, %v457_v51  ;;  %1301 = vmatmul.msk.f32.gmra.mxu0 %vm477_vm3, %v1297_v52 }
  0xc0   : > { %1293 = vmatmul.msk.f32.gmra.mxu3 %vm477_vm3, %v457_v51  ;;  %1305 = vmatmul.msk.f32.gmra.mxu1 %vm477_vm3, %v1297_v52 }
  0xc2   : > { %1310 = vmatmul.msk.f32.vlgmr.msra.gmra.mxu2 %vm477_vm3, %v1306_v53  ;;  %1322 = vmatmul.msk.f32.vlgmr.msra.gmra.mxu0 %vm477_vm3, %v1318_v54 }
  0xc8   : > { %1314 = vmatmul.msk.f32.vlgmr.msra.gmra.mxu3 %vm477_vm3, %v1306_v53  ;;  %1326 = vmatmul.msk.f32.vlgmr.msra.gmra.mxu1 %vm477_vm3, %v1318_v54 }
  0xca   : > { %1311 = vmatmul.msk.f32.gmra.mxu2 %vm477_vm3, %v1307_v55  ;;  %1323 = vmatmul.msk.f32.gmra.mxu0 %vm477_vm3, %v1319_v56 }
  0xd0   : > { %1315 = vmatmul.msk.f32.gmra.mxu3 %vm477_vm3, %v1307_v55  ;;  %1327 = vmatmul.msk.f32.gmra.mxu1 %vm477_vm3, %v1319_v56 }
  0xd2   : > { %1312 = vmatmul.msk.f32.gmra.mxu2 %vm477_vm3, %v1308_v57  ;;  %1324 = vmatmul.msk.f32.gmra.mxu0 %vm477_vm3, %v1320_v58 }
  0xd8   : > { %1316 = vmatmul.msk.f32.gmra.mxu3 %vm477_vm3, %v1308_v57  ;;  %1328 = vmatmul.msk.f32.gmra.mxu1 %vm477_vm3, %v1320_v58 }
  0xda   : > { %1313 = vmatmul.msk.f32.gmra.mxu2 %vm477_vm3, %v1309_v61  ;;  %1325 = vmatmul.msk.f32.gmra.mxu0 %vm477_vm3, %v1321_v62 }
  0xe0   : > { %1317 = vmatmul.msk.f32.gmra.mxu3 %vm477_vm3, %v1309_v61  ;;  %1329 = vmatmul.msk.f32.gmra.mxu1 %vm477_vm3, %v1321_v62 }
  0xe2   : > { %1334 = vmatmul.msk.f32.vlgmr.msrb.gmra.mxu2 %vm477_vm3, %v1330_v0  ;;  %1346 = vmatmul.msk.f32.vlgmr.msrb.gmra.mxu0 %vm477_vm3, %v1342_v1 }
  0xe8   : > { %1338 = vmatmul.msk.f32.vlgmr.msrb.gmra.mxu3 %vm477_vm3, %v1330_v0  ;;  %1350 = vmatmul.msk.f32.vlgmr.msrb.gmra.mxu1 %vm477_vm3, %v1342_v1 }
  0xea   : > { %1335 = vmatmul.msk.f32.gmra.mxu2 %vm477_vm3, %v1331_v3  ;;  %1347 = vmatmul.msk.f32.gmra.mxu0 %vm477_vm3, %v1343_v4 }
  0xf0   : > { %1339 = vmatmul.msk.f32.gmra.mxu3 %vm477_vm3, %v1331_v3  ;;  %1351 = vmatmul.msk.f32.gmra.mxu1 %vm477_vm3, %v1343_v4 }
  0xf2   : > { %1336 = vmatmul.msk.f32.gmra.mxu2 %vm477_vm3, %v1332_v5  ;;  %1348 = vmatmul.msk.f32.gmra.mxu0 %vm477_vm3, %v1344_v6 }
  0xf8   : > { %1340 = vmatmul.msk.f32.gmra.mxu3 %vm477_vm3, %v1332_v5  ;;  %1352 = vmatmul.msk.f32.gmra.mxu1 %vm477_vm3, %v1344_v6 }
  0xfa   : > { %1337 = vmatmul.msk.f32.gmra.mxu2 %vm477_vm3, %v1333_v7  ;;  %1349 = vmatmul.msk.f32.gmra.mxu0 %vm477_vm3, %v1345_v8 }
 0x100   : > { %1341 = vmatmul.msk.f32.gmra.mxu3 %vm477_vm3, %v1333_v7  ;;  %1353 = vmatmul.msk.f32.gmra.mxu1 %vm477_vm3, %v1345_v8 }
 0x10f   : > { %v507_v10 = vpop.f32.mrf.mxu0 }
 0x115   : > { %v513_v11 = vpop.f32.mrf.mxu2  ;;  %v536_v12 = vpop.f32.mrf.mxu1 }
 0x117   : > { %v510_v13 = vpop.f32.mrf.mxu0 }
 0x11b   : > { %v1802_v14 = vpop.f32.mrf.mxu3 }
 0x11d   : > { %v1804_v15 = vpop.f32.mrf.mxu2  ;;  %v539_v16 = vpop.f32.mrf.mxu1 }
 0x11f   : > { %v674_v17 = vpop.f32.mrf.mxu0 }
 0x123   : > { %v1806_v18 = vpop.f32.mrf.mxu3 }
 0x125   : > { %v588_v19 = vpop.f32.mrf.mxu2  ;;  %v703_v20 = vpop.f32.mrf.mxu1 }
 0x126   : > { %v589_v46 = vadd.f32 %v588_v19, %v507_v10 }
 0x127   : > { %v677_v21 = vpop.f32.mrf.mxu0 }
 0x128   : > { %v715_v49 = vadd.f32 %v674_v17, %v589_v46  ;;  %v1106_v46 = vpop.permute.xlu2 %1105 }
 0x12b   : > { %v617_v22 = vpop.f32.mrf.mxu3 }
 0x12c   : > { %v618_v52 = vadd.f32 %v617_v22, %v536_v12 }
 0x12d   : > { %v591_v23 = vpop.f32.mrf.mxu2  ;;  %v706_v24 = vpop.f32.mrf.mxu1 }
 0x12e   : > { %v592_v54 = vadd.f32 %v591_v23, %v510_v13  ;;  %v716_v56 = vadd.f32 %v703_v20, %v618_v52  ;;  %v1101_v20 = vpop.permute.xlu1 %1100 }
 0x12f   : > { %v680_v25 = vpop.f32.mrf.mxu0 }
 0x130   : > { %v717_v59 = vadd.f32 %v677_v21, %v592_v54 }
 0x133   : > { %v620_v26 = vpop.f32.mrf.mxu3 }
 0x134   : > { %v621_v0 = vadd.f32 %v620_v26, %v539_v16 }
 0x135   : > { %v594_v27 = vpop.f32.mrf.mxu2  ;;  %v1808_v28 = vpop.f32.mrf.mxu1 }
 0x136   : > { %v595_v4 = vadd.f32 %v594_v27, %v513_v11  ;;  %v718_v8 = vadd.f32 %v706_v24, %v621_v0 }
 0x137   : > { %v1810_v29 = vpop.f32.mrf.mxu0 }
 0x138   : > { %v719_v13 = vadd.f32 %v680_v25, %v595_v4 }
 0x13b   : > { %v623_v30 = vpop.f32.mrf.mxu3 }
 0x13c   : > { %v624_v11 = vadd.f32 %v623_v30, %v1802_v14 }
 0x13d   : > { %v597_v31 = vpop.f32.mrf.mxu2  ;;  %v1812_v32 = vpop.f32.mrf.mxu1 }
 0x13e   : > { %v598_v26 = vadd.f32 %v597_v31, %v1804_v15  ;;  %v720_v25 = vadd.f32 %v1808_v28, %v624_v11 }
 0x13f   : > { %v852_v33 = vpop.f32.mrf.mxu0 }
 0x143   : > { %v1814_v34 = vpop.f32.mrf.mxu3 }
 0x144   : > { %v627_v15 = vadd.f32 %v1814_v34, %v1806_v18 }
 0x145   : > { %v757_v35 = vpop.f32.mrf.mxu2  ;;  %v881_v36 = vpop.f32.mrf.mxu1 }
 0x146   : > { %v798_v53 = vadd.f32 %v757_v35, %v715_v49 }
 0x147   : > { %v855_v37 = vpop.f32.mrf.mxu0 }
 0x148   : > { %v893_v57 = vadd.f32 %v852_v33, %v798_v53 }
 0x14b   : > { %v786_v38 = vpop.f32.mrf.mxu3 }
 0x14c   : > { %v799_v60 = vadd.f32 %v786_v38, %v716_v56 }
 0x14d   : > { %v760_v39 = vpop.f32.mrf.mxu2  ;;  %v884_v40 = vpop.f32.mrf.mxu1 }
 0x14e   : > { %v800_v1 = vadd.f32 %v760_v39, %v717_v59  ;;  %v894_v5 = vadd.f32 %v881_v36, %v799_v60 }
 0x14f   : > { %v858_v41 = vpop.f32.mrf.mxu0 }
 0x150   : > { %v895_v9 = vadd.f32 %v855_v37, %v800_v1 }
 0x153   : > { %v789_v42 = vpop.f32.mrf.mxu3 }
 0x154   : > { %v801_v17 = vadd.f32 %v789_v42, %v718_v8  ;;  %v721_v42 = vadd.f32 %v1810_v29, %v598_v26  ;;  %v722_v29 = vadd.f32 %v1812_v32, %v627_v15 }
 0x155   : > { %v763_v43 = vpop.f32.mrf.mxu2  ;;  %v1816_v44 = vpop.f32.mrf.mxu1 }
 0x156   : > { %v802_v22 = vadd.f32 %v763_v43, %v719_v13  ;;  %v896_v27 = vadd.f32 %v884_v40, %v801_v17 }
 0x157   : > { %v1818_v45 = vpop.f32.mrf.mxu0 }
 0x158   : > { %v897_v37 = vadd.f32 %v858_v41, %v802_v22 }
 0x15b   : > { %v792_v47 = vpop.f32.mrf.mxu3 }
 0x15c   : > { %v803_v14 = vadd.f32 %v792_v47, %v720_v25 }
 0x15d   : > { %v766_v48 = vpop.f32.mrf.mxu2  ;;  %v1820_v50 = vpop.f32.mrf.mxu1 }
 0x15e   : > { %v804_v31 = vadd.f32 %v766_v48, %v721_v42  ;;  %v898_v41 = vadd.f32 %v1816_v44, %v803_v14 }
 0x15f   : > { %v1040_v51 = vpop.f32.mrf.mxu0 }
 0x160   : > { %v899_v47 = vadd.f32 %v1818_v45, %v804_v31 }
 0x163   : > { %v1822_v55 = vpop.f32.mrf.mxu3 }
 0x164   : > { %v805_v34 = vadd.f32 %v1822_v55, %v722_v29 }
 0x165   : > { %v946_v58 = vpop.f32.mrf.mxu2  ;;  %v1069_v62 = vpop.f32.mrf.mxu1 }
 0x166   : > { %v987_v61 = vadd.f32 %v946_v58, %v893_v57  ;;  %v1111_v58 = vpop.permute.xlu1 %1110  ;;  %v900_v32 = vadd.f32 %v1820_v50, %v805_v34 }
 0x167   : > { %v1043_v3 = vpop.f32.mrf.mxu0 }
 0x168   : > { %v1081_v2 = vadd.f32 %v1040_v51, %v987_v61 }
 0x16a   : > { %v1113_v6 = vadd.f32 %v1096_v63, %v1081_v2 }
 0x16b   : > { %v975_v7 = vpop.f32.mrf.mxu3 }
 0x16c   : > { %1121 = vst [vmem:[%s1827_s14] sm:$0xff] %v1113_v6  ;;  %v988_v10 = vadd.f32 %v975_v7, %v894_v5 }
 0x16d   : > { %v949_v12 = vpop.f32.mrf.mxu2  ;;  %v1072_v21 = vpop.f32.mrf.mxu1 }
 0x16e   : > { %v989_v19 = vadd.f32 %v949_v12, %v895_v9  ;;  %v1082_v16 = vadd.f32 %v1069_v62, %v988_v10 }
 0x16f   : > { %v1046_v36 = vpop.f32.mrf.mxu0 }
 0x170   : > { %v1114_v23 = vadd.f32 %v1096_v63, %v1082_v16  ;;  %v1083_v24 = vadd.f32 %v1043_v3, %v989_v19 }
 0x172   : > { %1122 = vst [vmem:[%s1827_s14 + $0x8] sm:$0xff] %v1114_v23  ;;  %v1115_v33 = vadd.f32 %v1101_v20, %v1083_v24 }
 0x173   : > { %v978_v35 = vpop.f32.mrf.mxu3 }
 0x174   : > { %1123 = vst [vmem:[%s1827_s14 + $0x10] sm:$0xff] %v1115_v33  ;;  %v990_v38 = vadd.f32 %v978_v35, %v896_v27 }
 0x175   : > { %v952_v39 = vpop.f32.mrf.mxu2  ;;  %v1075_v28 = vpop.f32.mrf.mxu1 }
 0x176   : > { %v991_v30 = vadd.f32 %v952_v39, %v897_v37  ;;  %v1084_v43 = vadd.f32 %v1072_v21, %v990_v38 }
 0x177   : > { %v1049_v18 = vpop.f32.mrf.mxu0 }
 0x178   : > { %v1116_v40 = vadd.f32 %v1101_v20, %v1084_v43  ;;  %v1085_v49 = vadd.f32 %v1046_v36, %v991_v30 }
 0x17a   : > { %1124 = vst [vmem:[%s1827_s14 + $0x18] sm:$0xff] %v1116_v40  ;;  %v1117_v51 = vadd.f32 %v1106_v46, %v1085_v49 }
 0x17b   : > { %v981_v52 = vpop.f32.mrf.mxu3 }
 0x17c   : > { %1125 = vst [vmem:[%s1827_s14 + $0x20] sm:$0xff] %v1117_v51  ;;  %v992_v53 = vadd.f32 %v981_v52, %v898_v41 }
 0x17d   : > { %v955_v54 = vpop.f32.mrf.mxu2  ;;  %v1078_v60 = vpop.f32.mrf.mxu1 }
 0x17e   : > { %v993_v48 = vadd.f32 %v955_v54, %v899_v47  ;;  %v1086_v56 = vadd.f32 %v1075_v28, %v992_v53 }
 0x180   : > { %v1118_v44 = vadd.f32 %v1106_v46, %v1086_v56  ;;  %v1087_v57 = vadd.f32 %v1049_v18, %v993_v48 }
 0x182   : > { %1126 = vst [vmem:[%s1827_s14 + $0x28] sm:$0xff] %v1118_v44  ;;  %v1119_v45 = vadd.f32 %v1111_v58, %v1087_v57 }
 0x183   : > { %v984_v59 = vpop.f32.mrf.mxu3 }
 0x184   : > { %1127 = vst [vmem:[%s1827_s14 + $0x30] sm:$0xff] %v1119_v45  ;;  %v994_v55 = vadd.f32 %v984_v59, %v900_v32 }
 0x186   : > { %v1088_v61 = vadd.f32 %v1078_v60, %v994_v55 }
 0x188   : > { %v1120_v62 = vadd.f32 %v1111_v58, %v1088_v61 }
 0x18a   : > { %1128 = vst [vmem:[%s1827_s14 + $0x38] sm:$0xff] %v1120_v62 }
 0x18b   : > { %1491 = shalt.err (!%p1488_p5)
}
 0x18c   : > { %s1552_s11 = smov 256   ;;  %s1553_s12 = smov 16  }
 0x18d   : > { %1366 = dma.vmem_to_hbm [thread:$0]  (%p1624_p4), %s1145_s23, 1024, %s1147_s20, %s1130_s25, %s1552_s11, %s1552_s11, %s1553_s12  }
 0x18e PF: > { %p1372_p6 = scmp.ge.s32.totalorder %s1542_s21, 2  ;;  %s1161_s13 = sand.u32 1, %s1522_s18  }
 0x18f   : > { %s1162_s14 = scalar_lea.sflag [#allocation3], %s1161_s13 }
 0x190   : > { %p1369_p7 = pnand %p1372_p6, %p1631_p8 }
 0x192   : > { %p1370_p9 = pneg %p1369_p7 }
 0x194   : > { %1517 = dma.done.wait (%p1370_p9), %s1162_s14, 1024  }
 0x195   : > { %1519 = vsyncadd (%p1370_p9), %s1162_s14, 4294966272  ;;  %s18_s21 = sadd.s32 1, %s1542_s21   ;;  %s1895_s18 = smov %s1526_s0 }
 0x196   : > { %p15_p10 = scmp.ge.s32.totalorder %s18_s21, 4   ;;  %s1896_s0 = smov %s1530_s19 }
 0x197   : > { %s1897_s19 = smov %s1637_s29  ;;  %s1898_s20 = smov %s1538_s2 }
 0x198   : > { %s1899_s2 = smov %s1901_s24  ;;  %17 = sbr.rel (!%p15_p10) target bundleno = 4 (0x4), region = 87 }
 0x19d   :  { %1168 = vsyncpa [#allocation3], 1 }
 0x19e   :  { %1170 = vsyncpa [#allocation3 + $0x1], 1 }

</bundles_post_ra>
